<compile_context>
chip_gen: v5e
topology: v5e:2x2
jax: 0.10.0
libtpu: 0.0.40
codegen_flags: <defaults>
</compile_context>

<pallas_src>
import functools

import jax
import jax.numpy as jnp
from jax.experimental import pallas as pl
from jax.experimental.pallas import tpu as pltpu

INPUT_UNITS = 11
OUTPUT_UNITS = 1
HIDDEN_UNITS = 256
PADDED_IN = 128    # 11 -> 128 lane-aligned input features
PADDED_OUT = 128   # 1  -> 128 lane-dense output columns


def mlp_kernel(x_ref, w0_ref, b0_ref, w1_ref, b1_ref, w2_ref, b2_ref,
               w3_ref, b3_ref, o_ref):
    """One batch tile of the 4-layer MLP. Matmuls on the MXU (bf16 or f32
    operands, f32 accumulation); bias/ReLU/sigmoid in f32 on VPU/EUP."""
    mxu_dt = w1_ref.dtype

    # Layer 0: Linear(128->256) + ReLU   (padded input cols hit zero w0 rows)
    h = jnp.dot(x_ref[...], w0_ref[...],
                preferred_element_type=jnp.float32) + b0_ref[...]
    h = jnp.maximum(h, 0.0)
    # Layer 1: Linear(256->256) + ReLU
    h = jnp.dot(h.astype(mxu_dt), w1_ref[...],
                preferred_element_type=jnp.float32) + b1_ref[...]
    h = jnp.maximum(h, 0.0)
    # Layer 2: Linear(256->256) + ReLU
    h = jnp.dot(h.astype(mxu_dt), w2_ref[...],
                preferred_element_type=jnp.float32) + b2_ref[...]
    h = jnp.maximum(h, 0.0)
    # Layer 3: Linear(256->128 padded) + Sigmoid (column 0 is the real output)
    y = jnp.dot(h.astype(mxu_dt), w3_ref[...],
                preferred_element_type=jnp.float32) + b3_ref[...]
    # sigmoid(y) = 1 / (1 + exp(-y)); exp and approx reciprocal both land on
    # the EUP slot, keeping the VALU free.
    o_ref[...] = pl.reciprocal(1.0 + jnp.exp(-y), approx=True).astype(o_ref.dtype)


@functools.partial(jax.jit, static_argnames=("tm", "use_bf16"))
def mlp_forward(x, params, *, tm=256, use_bf16=True):
    """x: (B, 11) float32.  params: dict with w{0..3}/b{0..3} (w as (in, out))."""
    B = x.shape[0]
    assert x.shape[1] == INPUT_UNITS
    mxu_dtype = jnp.bfloat16 if use_bf16 else jnp.float32

    # Batch tiling: tile is a multiple of 8 (sublane), batch zero-padded to a
    # multiple of the tile. tm=256 fills the 128/256-row MXU every pass.
    b_pad8 = -(-B // 8) * 8
    tm_eff = max(8, min(tm, b_pad8))
    tm_eff = -(-tm_eff // 8) * 8
    b_pad = -(-b_pad8 // tm_eff) * tm_eff
    grid = (b_pad // tm_eff,)

    # Lane/batch padding + MXU dtype casts (done once in the wrapper so the
    # kernel sees clean lane-aligned tiles and halved DMA bytes in bf16).
    xp = jnp.zeros((b_pad, PADDED_IN), mxu_dtype)
    xp = xp.at[:B, :INPUT_UNITS].set(x.astype(mxu_dtype))

    w0 = jnp.zeros((PADDED_IN, HIDDEN_UNITS), mxu_dtype)
    w0 = w0.at[:INPUT_UNITS, :].set(params["w0"].astype(mxu_dtype))
    w1 = params["w1"].astype(mxu_dtype)
    w2 = params["w2"].astype(mxu_dtype)
    w3 = jnp.zeros((HIDDEN_UNITS, PADDED_OUT), mxu_dtype)
    w3 = w3.at[:, :OUTPUT_UNITS].set(params["w3"].astype(mxu_dtype))

    b0 = params["b0"].astype(jnp.float32)
    b1 = params["b1"].astype(jnp.float32)
    b2 = params["b2"].astype(jnp.float32)
    b3 = jnp.zeros((1, PADDED_OUT), jnp.float32)
    b3 = b3.at[:, :OUTPUT_UNITS].set(params["b3"].astype(jnp.float32))

    # Weights/biases: full-block, constant index map -> VMEM-resident.
    full = lambda a: pl.BlockSpec(a.shape, lambda i: (0, 0))
    grid_spec = pltpu.PrefetchScalarGridSpec(
        num_scalar_prefetch=0,
        grid=grid,
        in_specs=[
            pl.BlockSpec((tm_eff, PADDED_IN), lambda i: (i, 0)),   # x tile
            full(w0), full(b0),
            full(w1), full(b1),
            full(w2), full(b2),
            full(w3), full(b3),
        ],
        out_specs=pl.BlockSpec((tm_eff, PADDED_OUT), lambda i: (i, 0)),
    )
    out = pl.pallas_call(
        mlp_kernel,
        out_shape=jax.ShapeDtypeStruct((b_pad, PADDED_OUT), jnp.float32),
        grid_spec=grid_spec,
        compiler_params=pltpu.CompilerParams(
            dimension_semantics=("parallel",)),   # shards across TCs on v7x
    )(xp, w0, b0, w1, b1, w2, b2, w3, b3)

    # Strip batch padding and the 127 padded output lanes.
    return out[:B, :OUTPUT_UNITS]


def init_params(key):
    """Deterministic init mimicking PyTorch nn.Linear default (uniform ±1/sqrt(fan_in)).
    Weights stored as (in_features, out_features) == PyTorch W.T."""
    dims = [(INPUT_UNITS, HIDDEN_UNITS),
            (HIDDEN_UNITS, HIDDEN_UNITS),
            (HIDDEN_UNITS, HIDDEN_UNITS),
            (HIDDEN_UNITS, OUTPUT_UNITS)]
    params = {}
    for idx, (fan_in, fan_out) in enumerate(dims):
        key, kw, kb = jax.random.split(key, 3)
        bound = 1.0 / (fan_in ** 0.5)
        params[f"w{idx}"] = jax.random.uniform(
            kw, (fan_in, fan_out), jnp.float32, minval=-bound, maxval=bound)
        params[f"b{idx}"] = jax.random.uniform(
            kb, (1, fan_out), jnp.float32, minval=-bound, maxval=bound)
    return params


def mlp_reference(x, p, use_bf16=True):
    """Pure-JAX reference with matching MXU-operand dtype."""
    dt = jnp.bfloat16 if use_bf16 else jnp.float32

    def lin(h, w, b):
        return jnp.dot(h.astype(dt), w.astype(dt),
                       preferred_element_type=jnp.float32) + b

    h = jnp.maximum(lin(x, p["w0"], p["b0"]), 0.0)
    h = jnp.maximum(lin(h, p["w1"], p["b1"]), 0.0)
    h = jnp.maximum(lin(h, p["w2"], p["b2"]), 0.0)
    y = lin(h, p["w3"], p["b3"])
    return 1.0 / (1.0 + jnp.exp(-y))


if __name__ == "__main__":
    key = jax.random.PRNGKey(0)
    kx, kp = jax.random.split(key)
    B = 16  # small demo batch; tm clamps to the padded batch automatically
    x = jax.random.normal(kx, (B, INPUT_UNITS), jnp.float32)
    params = init_params(kp)

    out = jax.block_until_ready(mlp_forward(x, params, tm=256, use_bf16=True))
    assert out.shape == (B, OUTPUT_UNITS)

    ref_bf16 = mlp_reference(x, params, use_bf16=True)   # same MXU dtype
    ref_f32 = mlp_reference(x, params, use_bf16=False)   # module semantics
    assert jnp.allclose(out, ref_bf16, atol=5e-3, rtol=5e-3), "mismatch vs bf16 reference"
    assert jnp.allclose(out, ref_f32, atol=2e-2, rtol=2e-2), "mismatch vs f32 reference"
    print("KERNEL_OK")
</pallas_src>

<mosaic_0001>
module attributes {stable_mosaic.version = 11 : i64} {
  func.func @mlp_kernel(%arg0: i32, %arg1: memref<16x128xbf16, #tpu.memory_space<vmem>>, %arg2: memref<128x256xbf16, #tpu.memory_space<vmem>>, %arg3: memref<1x256xf32, #tpu.memory_space<vmem>>, %arg4: memref<256x256xbf16, #tpu.memory_space<vmem>>, %arg5: memref<1x256xf32, #tpu.memory_space<vmem>>, %arg6: memref<256x256xbf16, #tpu.memory_space<vmem>>, %arg7: memref<1x256xf32, #tpu.memory_space<vmem>>, %arg8: memref<256x128xbf16, #tpu.memory_space<vmem>>, %arg9: memref<1x128xf32, #tpu.memory_space<vmem>>, %arg10: memref<16x128xf32, #tpu.memory_space<vmem>>) attributes {dimension_semantics = [#tpu.dimension_semantics<parallel>], iteration_bounds = array<i64: 1>, scalar_prefetch = 0 : i64, scratch_operands = 0 : i64, tpu.core_type = #tpu.core_type<tc>, window_params = [{transform_indices = @transform_0, window_bounds = array<i64: 16, 128>}, {pipeline_mode = #tpu.pipeline_mode<synchronous>, transform_indices = @transform_1, window_bounds = array<i64: 128, 256>}, {pipeline_mode = #tpu.pipeline_mode<synchronous>, transform_indices = @transform_2, window_bounds = array<i64: 1, 256>}, {pipeline_mode = #tpu.pipeline_mode<synchronous>, transform_indices = @transform_3, window_bounds = array<i64: 256, 256>}, {pipeline_mode = #tpu.pipeline_mode<synchronous>, transform_indices = @transform_4, window_bounds = array<i64: 1, 256>}, {pipeline_mode = #tpu.pipeline_mode<synchronous>, transform_indices = @transform_5, window_bounds = array<i64: 256, 256>}, {pipeline_mode = #tpu.pipeline_mode<synchronous>, transform_indices = @transform_6, window_bounds = array<i64: 1, 256>}, {pipeline_mode = #tpu.pipeline_mode<synchronous>, transform_indices = @transform_7, window_bounds = array<i64: 256, 128>}, {pipeline_mode = #tpu.pipeline_mode<synchronous>, transform_indices = @transform_8, window_bounds = array<i64: 1, 128>}, {transform_indices = @transform_9, window_bounds = array<i64: 16, 128>}]} {
    %c0 = arith.constant 0 : index
    %c0_0 = arith.constant 0 : index
    %0 = vector.load %arg1[%c0, %c0_0] : memref<16x128xbf16, #tpu.memory_space<vmem>>, vector<16x128xbf16>
    %c0_1 = arith.constant 0 : index
    %c0_2 = arith.constant 0 : index
    %1 = vector.load %arg2[%c0_1, %c0_2] : memref<128x256xbf16, #tpu.memory_space<vmem>>, vector<128x256xbf16>
    %cst = arith.constant dense<0.000000e+00> : vector<16x256xf32>
    %2 = tpu.matmul %0, %1, %cst {dimension_numbers = #tpu.dot_dimension_numbers<[1], [0], [0], [1], [0, 0, 1, 1], [], []>} : vector<16x128xbf16>, vector<128x256xbf16>, vector<16x256xf32> -> vector<16x256xf32>
    %c0_3 = arith.constant 0 : index
    %c0_4 = arith.constant 0 : index
    %3 = vector.load %arg3[%c0_3, %c0_4] : memref<1x256xf32, #tpu.memory_space<vmem>>, vector<1x256xf32>
    %4 = vector.broadcast %3 : vector<1x256xf32> to vector<16x256xf32>
    %5 = arith.addf %2, %4 : vector<16x256xf32>
    %cst_5 = arith.constant 0.000000e+00 : f32
    %6 = vector.broadcast %cst_5 : f32 to vector<16x256xf32>
    %7 = arith.maximumf %5, %6 : vector<16x256xf32>
    %8 = arith.truncf %7 : vector<16x256xf32> to vector<16x256xbf16>
    %c0_6 = arith.constant 0 : index
    %c0_7 = arith.constant 0 : index
    %9 = vector.load %arg4[%c0_6, %c0_7] : memref<256x256xbf16, #tpu.memory_space<vmem>>, vector<256x256xbf16>
    %cst_8 = arith.constant dense<0.000000e+00> : vector<16x256xf32>
    %10 = tpu.matmul %8, %9, %cst_8 {dimension_numbers = #tpu.dot_dimension_numbers<[1], [0], [0], [1], [0, 0, 1, 1], [], []>} : vector<16x256xbf16>, vector<256x256xbf16>, vector<16x256xf32> -> vector<16x256xf32>
    %c0_9 = arith.constant 0 : index
    %c0_10 = arith.constant 0 : index
    %11 = vector.load %arg5[%c0_9, %c0_10] : memref<1x256xf32, #tpu.memory_space<vmem>>, vector<1x256xf32>
    %12 = vector.broadcast %11 : vector<1x256xf32> to vector<16x256xf32>
    %13 = arith.addf %10, %12 : vector<16x256xf32>
    %cst_11 = arith.constant 0.000000e+00 : f32
    %14 = vector.broadcast %cst_11 : f32 to vector<16x256xf32>
    %15 = arith.maximumf %13, %14 : vector<16x256xf32>
    %16 = arith.truncf %15 : vector<16x256xf32> to vector<16x256xbf16>
    %c0_12 = arith.constant 0 : index
    %c0_13 = arith.constant 0 : index
    %17 = vector.load %arg6[%c0_12, %c0_13] : memref<256x256xbf16, #tpu.memory_space<vmem>>, vector<256x256xbf16>
    %cst_14 = arith.constant dense<0.000000e+00> : vector<16x256xf32>
    %18 = tpu.matmul %16, %17, %cst_14 {dimension_numbers = #tpu.dot_dimension_numbers<[1], [0], [0], [1], [0, 0, 1, 1], [], []>} : vector<16x256xbf16>, vector<256x256xbf16>, vector<16x256xf32> -> vector<16x256xf32>
    %c0_15 = arith.constant 0 : index
    %c0_16 = arith.constant 0 : index
    %19 = vector.load %arg7[%c0_15, %c0_16] : memref<1x256xf32, #tpu.memory_space<vmem>>, vector<1x256xf32>
    %20 = vector.broadcast %19 : vector<1x256xf32> to vector<16x256xf32>
    %21 = arith.addf %18, %20 : vector<16x256xf32>
    %cst_17 = arith.constant 0.000000e+00 : f32
    %22 = vector.broadcast %cst_17 : f32 to vector<16x256xf32>
    %23 = arith.maximumf %21, %22 : vector<16x256xf32>
    %24 = arith.truncf %23 : vector<16x256xf32> to vector<16x256xbf16>
    %c0_18 = arith.constant 0 : index
    %c0_19 = arith.constant 0 : index
    %25 = vector.load %arg8[%c0_18, %c0_19] : memref<256x128xbf16, #tpu.memory_space<vmem>>, vector<256x128xbf16>
    %cst_20 = arith.constant dense<0.000000e+00> : vector<16x128xf32>
    %26 = tpu.matmul %24, %25, %cst_20 {dimension_numbers = #tpu.dot_dimension_numbers<[1], [0], [0], [1], [0, 0, 1, 1], [], []>} : vector<16x256xbf16>, vector<256x128xbf16>, vector<16x128xf32> -> vector<16x128xf32>
    %c0_21 = arith.constant 0 : index
    %c0_22 = arith.constant 0 : index
    %27 = vector.load %arg9[%c0_21, %c0_22] : memref<1x128xf32, #tpu.memory_space<vmem>>, vector<1x128xf32>
    %28 = vector.broadcast %27 : vector<1x128xf32> to vector<16x128xf32>
    %29 = arith.addf %26, %28 : vector<16x128xf32>
    %cst_23 = arith.constant 0.000000e+00 : f32
    %30 = vector.broadcast %cst_23 : f32 to vector<16x128xf32>
    %31 = arith.subf %30, %29 : vector<16x128xf32>
    %32 = math.exp %31 : vector<16x128xf32>
    %cst_24 = arith.constant 1.000000e+00 : f32
    %33 = vector.broadcast %cst_24 : f32 to vector<16x128xf32>
    %34 = arith.addf %33, %32 : vector<16x128xf32>
    %35 = tpu.reciprocal %34 {approx = true} : vector<16x128xf32> -> vector<16x128xf32>
    %c0_25 = arith.constant 0 : index
    %c0_26 = arith.constant 0 : index
    %36 = vector.load %arg10[%c0_25, %c0_26] : memref<16x128xf32, #tpu.memory_space<vmem>>, vector<16x128xf32>
    tpu.vector_store %arg10[%c0_25, %c0_26], %35 {strides = array<i32>} : memref<16x128xf32, #tpu.memory_space<vmem>>, vector<16x128xf32>,
    return
  }
  func.func @transform_0(%arg0: i32) -> (i32, i32) {
    %c0_i32 = arith.constant 0 : i32
    %c0_i32_0 = arith.constant 0 : i32
    return %arg0, %c0_i32 : i32, i32
  }
  func.func @transform_1(%arg0: i32) -> (i32, i32) {
    %c0_i32 = arith.constant 0 : i32
    %c0_i32_0 = arith.constant 0 : i32
    %c0_i32_1 = arith.constant 0 : i32
    return %c0_i32, %c0_i32_0 : i32, i32
  }
  func.func @transform_2(%arg0: i32) -> (i32, i32) {
    %c0_i32 = arith.constant 0 : i32
    %c0_i32_0 = arith.constant 0 : i32
    %c0_i32_1 = arith.constant 0 : i32
    return %c0_i32, %c0_i32_0 : i32, i32
  }
  func.func @transform_3(%arg0: i32) -> (i32, i32) {
    %c0_i32 = arith.constant 0 : i32
    %c0_i32_0 = arith.constant 0 : i32
    %c0_i32_1 = arith.constant 0 : i32
    return %c0_i32, %c0_i32_0 : i32, i32
  }
  func.func @transform_4(%arg0: i32) -> (i32, i32) {
    %c0_i32 = arith.constant 0 : i32
    %c0_i32_0 = arith.constant 0 : i32
    %c0_i32_1 = arith.constant 0 : i32
    return %c0_i32, %c0_i32_0 : i32, i32
  }
  func.func @transform_5(%arg0: i32) -> (i32, i32) {
    %c0_i32 = arith.constant 0 : i32
    %c0_i32_0 = arith.constant 0 : i32
    %c0_i32_1 = arith.constant 0 : i32
    return %c0_i32, %c0_i32_0 : i32, i32
  }
  func.func @transform_6(%arg0: i32) -> (i32, i32) {
    %c0_i32 = arith.constant 0 : i32
    %c0_i32_0 = arith.constant 0 : i32
    %c0_i32_1 = arith.constant 0 : i32
    return %c0_i32, %c0_i32_0 : i32, i32
  }
  func.func @transform_7(%arg0: i32) -> (i32, i32) {
    %c0_i32 = arith.constant 0 : i32
    %c0_i32_0 = arith.constant 0 : i32
    %c0_i32_1 = arith.constant 0 : i32
    return %c0_i32, %c0_i32_0 : i32, i32
  }
  func.func @transform_8(%arg0: i32) -> (i32, i32) {
    %c0_i32 = arith.constant 0 : i32
    %c0_i32_0 = arith.constant 0 : i32
    %c0_i32_1 = arith.constant 0 : i32
    return %c0_i32, %c0_i32_0 : i32, i32
  }
  func.func @transform_9(%arg0: i32) -> (i32, i32) {
    %c0_i32 = arith.constant 0 : i32
    %c0_i32_0 = arith.constant 0 : i32
    return %arg0, %c0_i32 : i32, i32
  }
}

</mosaic_0001>

<bundles_post_ra>
// kernel: mlp_forward.1
= control target key start
LH: loop header
LB: loop body
LE: loop exit
PB: predicated region body
PF: predicated region fallthrough
CT: control target
= control target key end

     0   :  { %s1965_s1 = inlined_call_operand.vmem [shape: bf16[128,256], index: 1, kind: input, shape index: {}]   ;;  %s1966_s3 = inlined_call_operand.vmem [shape: bf16[256,256], index: 3, kind: input, shape index: {}]   ;;  %s1967_s0 = inlined_call_operand.vmem [shape: bf16[16,128], index: 0, kind: input, shape index: {}]   ;;  %s1968_s5 = inlined_call_operand.vmem [shape: bf16[256,256], index: 5, kind: input, shape index: {}]   ;;  %s1969_s2 = inlined_call_operand.vmem [shape: f32[1,256], index: 2, kind: input, shape index: {}]   ;;  %s1970_s7 = inlined_call_operand.vmem [shape: bf16[256,128], index: 7, kind: input, shape index: {}]   ;;  %s1971_s4 = inlined_call_operand.vmem [shape: f32[1,256], index: 4, kind: input, shape index: {}]   ;;  %s1972_s6 = inlined_call_operand.vmem [shape: f32[1,256], index: 6, kind: input, shape index: {}]   ;;  %s1973_s8 = inlined_call_operand.vmem [shape: f32[1,128], index: 8, kind: input, shape index: {}]   ;;  %s1974_s9 = inlined_call_operand.vmem [shape: f32[16,128], index: 9, kind: output, shape index: {}]  }
   0x1   :  { %v934_v0 = vld [vmem:[%s1965_s1 + $0x70] sm:$0xf]  ;;  %v1276_v1 = vld [vmem:[%s1965_s1 + $0x74] sm:$0xf0]  ;;  %v1275_v2 = vld [vmem:[%s1965_s1 + $0x74] sm:$0xf] }
   0x2   :  { %v935_v3 = vor.u32 %v1276_v1, %v934_v0  ;;  %v936_v4 = vld [vmem:[%s1965_s1 + $0x78] sm:$0xf0]  ;;  %v926_v5 = vld [vmem:[%s1965_s1 + $0x60] sm:$0xf]  ;;  %v1274_v6 = vld [vmem:[%s1965_s1 + $0x64] sm:$0xf0] }
   0x3   :  { %v939_v7 = vor.u32 %v1275_v2, %v936_v4  ;;  %v1273_v8 = vld [vmem:[%s1965_s1 + $0x64] sm:$0xf]  ;;  %v928_v9 = vld [vmem:[%s1965_s1 + $0x68] sm:$0xf0]  ;;  %v927_v10 = vor.u32 %v1274_v6, %v926_v5  ;;  %v918_v12 = vld [vmem:[%s1965_s1 + $0x50] sm:$0xf] }
   0x4   :  { %142 = vmatpush.bf16.msra.mxu0 %v935_v3  ;;  %v931_v11 = vor.u32 %v1273_v8, %v928_v9  ;;  %v1272_v13 = vld [vmem:[%s1965_s1 + $0x54] sm:$0xf0]  ;;  %v1271_v14 = vld [vmem:[%s1965_s1 + $0x54] sm:$0xf]  ;;  %v920_v15 = vld [vmem:[%s1965_s1 + $0x58] sm:$0xf0] }
   0x5   :  { %156 = vmatpush.bf16.msra.mxu1 %v939_v7  ;;  %v919_v16 = vor.u32 %v1272_v13, %v918_v12  ;;  %v923_v17 = vor.u32 %v1271_v14, %v920_v15  ;;  %v910_v18 = vld [vmem:[%s1965_s1 + $0x40] sm:$0xf]  ;;  %v1270_v19 = vld [vmem:[%s1965_s1 + $0x44] sm:$0xf0]  ;;  %v1269_v20 = vld [vmem:[%s1965_s1 + $0x44] sm:$0xf] }
   0x6   :  { %v912_v21 = vld [vmem:[%s1965_s1 + $0x48] sm:$0xf0]  ;;  %v911_v22 = vor.u32 %v1270_v19, %v910_v18  ;;  %v998_v23 = vld [vmem:[%s1966_s3 + $0x70] sm:$0xf]  ;;  %v1292_v24 = vld [vmem:[%s1966_s3 + $0x74] sm:$0xf0] }
   0x7   :  { %v1062_v25 = vld [vmem:[%s1966_s3 + $0xf0] sm:$0xf]  ;;  %v915_v26 = vor.u32 %v1269_v20, %v912_v21  ;;  %v1268_v28 = vld [vmem:[%s1965_s1 + $0x34] sm:$0xf0]  ;;  %v999_v29 = vor.u32 %v1292_v24, %v998_v23  ;;  %v1267_v31 = vld [vmem:[%s1965_s1 + $0x34] sm:$0xf] }
   0x8   :  { %143 = vmatpush.bf16.msra.mxu0 %v927_v10  ;;  %v902_v27 = vld [vmem:[%s1965_s1 + $0x30] sm:$0xf]  ;;  %v1308_v30 = vld [vmem:[%s1966_s3 + $0xf4] sm:$0xf0]  ;;  %v904_v32 = vld [vmem:[%s1965_s1 + $0x38] sm:$0xf0] }
   0x9   :  { %157 = vmatpush.bf16.msra.mxu1 %v931_v11  ;;  %v1063_v33 = vor.u32 %v1308_v30, %v1062_v25  ;;  %v990_v34 = vld [vmem:[%s1966_s3 + $0x60] sm:$0xf]  ;;  %374 = vmatpush.bf16.msra.mxu2 %v999_v29  ;;  %v1290_v35 = vld [vmem:[%s1966_s3 + $0x64] sm:$0xf0]  ;;  %v903_v38 = vor.u32 %v1268_v28, %v902_v27  ;;  %v907_v43 = vor.u32 %v1267_v31, %v904_v32  ;;  %v1265_v44 = vld [vmem:[%s1965_s1 + $0x24] sm:$0xf] }
   0xa   :  { %v1054_v36 = vld [vmem:[%s1966_s3 + $0xe0] sm:$0xf]  ;;  %v1306_v37 = vld [vmem:[%s1966_s3 + $0xe4] sm:$0xf0]  ;;  %v991_v41 = vor.u32 %v1290_v35, %v990_v34  ;;  %v982_v45 = vld [vmem:[%s1966_s3 + $0x50] sm:$0xf] }
   0xb   :  { %v894_v39 = vld [vmem:[%s1965_s1 + $0x20] sm:$0xf]  ;;  %v1266_v40 = vld [vmem:[%s1965_s1 + $0x24] sm:$0xf0]  ;;  %388 = vmatpush.bf16.msra.mxu3 %v1063_v33  ;;  %v1055_v42 = vor.u32 %v1306_v37, %v1054_v36  ;;  %v1288_v46 = vld [vmem:[%s1966_s3 + $0x54] sm:$0xf0] }
   0xc   :  { %144 = vmatpush.bf16.msra.mxu0 %v919_v16  ;;  %v896_v47 = vld [vmem:[%s1965_s1 + $0x28] sm:$0xf0]  ;;  %v1046_v48 = vld [vmem:[%s1966_s3 + $0xd0] sm:$0xf]  ;;  %v1304_v49 = vld [vmem:[%s1966_s3 + $0xd4] sm:$0xf0]  ;;  %v983_v50 = vor.u32 %v1288_v46, %v982_v45  ;;  %v895_v51 = vor.u32 %v1266_v40, %v894_v39 }
   0xd   :  { %158 = vmatpush.bf16.msra.mxu1 %v923_v17  ;;  %375 = vmatpush.bf16.msra.mxu2 %v991_v41  ;;  %v886_v52 = vld [vmem:[%s1965_s1 + $0x10] sm:$0xf]  ;;  %v1047_v53 = vor.u32 %v1304_v49, %v1046_v48  ;;  %v974_v54 = vld [vmem:[%s1966_s3 + $0x40] sm:$0xf]  ;;  %v1286_v55 = vld [vmem:[%s1966_s3 + $0x44] sm:$0xf0]  ;;  %v899_v56 = vor.u32 %v1265_v44, %v896_v47 }
   0xe   :  { %v1264_v57 = vld [vmem:[%s1965_s1 + $0x14] sm:$0xf0]  ;;  %v1038_v58 = vld [vmem:[%s1966_s3 + $0xc0] sm:$0xf]  ;;  %v1302_v59 = vld [vmem:[%s1966_s3 + $0xc4] sm:$0xf0]  ;;  %v975_v62 = vor.u32 %v1286_v55, %v974_v54 }
   0xf   :  { %389 = vmatpush.bf16.msra.mxu3 %v1055_v42  ;;  %v1263_v60 = vld [vmem:[%s1965_s1 + $0x14] sm:$0xf]  ;;  %v888_v61 = vld [vmem:[%s1965_s1 + $0x18] sm:$0xf0]  ;;  %v887_v63 = vor.u32 %v1264_v57, %v886_v52  ;;  %v1039_v0 = vor.u32 %v1302_v59, %v1038_v58  ;;  %v878_v2 = vld [vmem:[%s1965_s1] sm:$0xf] }
  0x10   :  { %145 = vmatpush.bf16.msra.mxu0 %v911_v22  ;;  %v891_v1 = vor.u32 %v1263_v60, %v888_v61  ;;  %v1262_v3 = vld [vmem:[%s1965_s1 + $0x4] sm:$0xf0]  ;;  %v1261_v4 = vld [vmem:[%s1965_s1 + $0x4] sm:$0xf]  ;;  %v880_v5 = vld [vmem:[%s1965_s1 + $0x8] sm:$0xf0] }
  0x11   :  { %159 = vmatpush.bf16.msra.mxu1 %v915_v26  ;;  %376 = vmatpush.bf16.msra.mxu2 %v983_v50  ;;  %v1291_v6 = vld [vmem:[%s1966_s3 + $0x74] sm:$0xf]  ;;  %v1000_v7 = vld [vmem:[%s1966_s3 + $0x78] sm:$0xf0]  ;;  %v879_v10 = vor.u32 %v1262_v3, %v878_v2  ;;  %v883_v11 = vor.u32 %v1261_v4, %v880_v5  ;;  %v1289_v14 = vld [vmem:[%s1966_s3 + $0x64] sm:$0xf] }
  0x12   :  { %v1307_v8 = vld [vmem:[%s1966_s3 + $0xf4] sm:$0xf]  ;;  %v1064_v9 = vld [vmem:[%s1966_s3 + $0xf8] sm:$0xf0]  ;;  %v1003_v12 = vor.u32 %v1291_v6, %v1000_v7  ;;  %v992_v15 = vld [vmem:[%s1966_s3 + $0x68] sm:$0xf0] }
  0x13   :  { %390 = vmatpush.bf16.msra.mxu3 %v1047_v53  ;;  %v1067_v13 = vor.u32 %v1307_v8, %v1064_v9  ;;  %v1260_v16 = vld [vmem:[%s1967_s0] sm:$0xff]  ;;  %v1056_v18 = vld [vmem:[%s1966_s3 + $0xe8] sm:$0xf0]  ;;  %v995_v19 = vor.u32 %v1289_v14, %v992_v15  ;;  %v1287_v21 = vld [vmem:[%s1966_s3 + $0x54] sm:$0xf] }
  0x14   :  { %146 = vmatpush.bf16.msra.mxu0 %v903_v38  ;;  %v1305_v17 = vld [vmem:[%s1966_s3 + $0xe4] sm:$0xf]  ;;  %v984_v22 = vld [vmem:[%s1966_s3 + $0x58] sm:$0xf0]  ;;  %v1303_v23 = vld [vmem:[%s1966_s3 + $0xd4] sm:$0xf] }
  0x15   :  { %160 = vmatpush.bf16.msra.mxu1 %v907_v43  ;;  %377 = vmatpush.bf16.msra.mxu2 %v975_v62  ;;  %v1059_v20 = vor.u32 %v1305_v17, %v1056_v18  ;;  %v1048_v24 = vld [vmem:[%s1966_s3 + $0xd8] sm:$0xf0]  ;;  %v987_v25 = vor.u32 %v1287_v21, %v984_v22  ;;  %v1285_v27 = vld [vmem:[%s1966_s3 + $0x44] sm:$0xf]  ;;  %v976_v28 = vld [vmem:[%s1966_s3 + $0x48] sm:$0xf0] }
  0x16   :  { %v1051_v26 = vor.u32 %v1303_v23, %v1048_v24  ;;  %v1301_v29 = vld [vmem:[%s1966_s3 + $0xc4] sm:$0xf]  ;;  %v1040_v30 = vld [vmem:[%s1966_s3 + $0xc8] sm:$0xf0]  ;;  %v979_v31 = vor.u32 %v1285_v27, %v976_v28  ;;  %v966_v33 = vld [vmem:[%s1966_s3 + $0x30] sm:$0xf] }
  0x17   :  { %391 = vmatpush.bf16.msra.mxu3 %v1039_v0  ;;  %v1043_v32 = vor.u32 %v1301_v29, %v1040_v30  ;;  %v1284_v34 = vld [vmem:[%s1966_s3 + $0x34] sm:$0xf0]  ;;  %v1030_v35 = vld [vmem:[%s1966_s3 + $0xb0] sm:$0xf]  ;;  %v1283_v38 = vld [vmem:[%s1966_s3 + $0x34] sm:$0xf] }
  0x18   :  { %147 = vmatpush.bf16.msra.mxu0 %v895_v51  ;;  %v967_v36 = vor.u32 %v1284_v34, %v966_v33  ;;  %v1300_v37 = vld [vmem:[%s1966_s3 + $0xb4] sm:$0xf0]  ;;  %v968_v39 = vld [vmem:[%s1966_s3 + $0x38] sm:$0xf0]  ;;  %v1299_v42 = vld [vmem:[%s1966_s3 + $0xb4] sm:$0xf] }
  0x19   :  { %161 = vmatpush.bf16.msra.mxu1 %v899_v56  ;;  %v1031_v40 = vor.u32 %v1300_v37, %v1030_v35  ;;  %v971_v41 = vor.u32 %v1283_v38, %v968_v39  ;;  %v1032_v43 = vld [vmem:[%s1966_s3 + $0xb8] sm:$0xf0]  ;;  %v958_v45 = vld [vmem:[%s1966_s3 + $0x20] sm:$0xf]  ;;  %v1282_v46 = vld [vmem:[%s1966_s3 + $0x24] sm:$0xf0] }
  0x1a   :  { %378 = vmatpush.bf16.msra.mxu2 %v967_v36  ;;  %v1035_v44 = vor.u32 %v1299_v42, %v1032_v43  ;;  %v959_v47 = vor.u32 %v1282_v46, %v958_v45  ;;  %v1022_v48 = vld [vmem:[%s1966_s3 + $0xa0] sm:$0xf]  ;;  %v1298_v49 = vld [vmem:[%s1966_s3 + $0xa4] sm:$0xf0]  ;;  %v1281_v50 = vld [vmem:[%s1966_s3 + $0x24] sm:$0xf] }
  0x1b   :  { %392 = vmatpush.bf16.msra.mxu3 %v1031_v40  ;;  %v1023_v51 = vor.u32 %v1298_v49, %v1022_v48  ;;  %v960_v52 = vld [vmem:[%s1966_s3 + $0x28] sm:$0xf0]  ;;  %v1297_v53 = vld [vmem:[%s1966_s3 + $0xa4] sm:$0xf]  ;;  %v950_v57 = vld [vmem:[%s1966_s3 + $0x10] sm:$0xf] }
  0x1c   :  { %148 = vmatpush.bf16.msra.mxu0 %v887_v63  ;;  %v1024_v54 = vld [vmem:[%s1966_s3 + $0xa8] sm:$0xf0]  ;;  %v963_v55 = vor.u32 %v1281_v50, %v960_v52  ;;  %v1280_v58 = vld [vmem:[%s1966_s3 + $0x14] sm:$0xf0]  ;;  %v1014_v59 = vld [vmem:[%s1966_s3 + $0x90] sm:$0xf] }
  0x1d   :  { %162 = vmatpush.bf16.msra.mxu1 %v891_v1  ;;  %v1027_v56 = vor.u32 %v1297_v53, %v1024_v54  ;;  %v951_v60 = vor.u32 %v1280_v58, %v950_v57  ;;  %v1296_v61 = vld [vmem:[%s1966_s3 + $0x94] sm:$0xf0]  ;;  %v1279_v62 = vld [vmem:[%s1966_s3 + $0x14] sm:$0xf]  ;;  %v952_v63 = vld [vmem:[%s1966_s3 + $0x18] sm:$0xf0] }
  0x1e   :  { %379 = vmatpush.bf16.msra.mxu2 %v959_v47  ;;  %v1015_v0 = vor.u32 %v1296_v61, %v1014_v59  ;;  %v955_v1 = vor.u32 %v1279_v62, %v952_v63  ;;  %v1295_v2 = vld [vmem:[%s1966_s3 + $0x94] sm:$0xf]  ;;  %v1016_v3 = vld [vmem:[%s1966_s3 + $0x98] sm:$0xf0]  ;;  %v942_v5 = vld [vmem:[%s1966_s3] sm:$0xf] }
  0x1f   :  { %393 = vmatpush.bf16.msra.mxu3 %v1023_v51  ;;  %v1019_v4 = vor.u32 %v1295_v2, %v1016_v3  ;;  %v1278_v6 = vld [vmem:[%s1966_s3 + $0x4] sm:$0xf0]  ;;  %v1006_v7 = vld [vmem:[%s1966_s3 + $0x80] sm:$0xf]  ;;  %v1293_v14 = vld [vmem:[%s1966_s3 + $0x84] sm:$0xf] }
  0x20   :  { %149 = vmatpush.bf16.msra.mxu0 %v879_v10  ;;  %v943_v8 = vor.u32 %v1278_v6, %v942_v5  ;;  %v1294_v9 = vld [vmem:[%s1966_s3 + $0x84] sm:$0xf0]  ;;  %v1277_v10 = vld [vmem:[%s1966_s3 + $0x4] sm:$0xf]  ;;  %v1008_v15 = vld [vmem:[%s1966_s3 + $0x88] sm:$0xf0] }
  0x21   :  { %163 = vmatpush.bf16.msra.mxu1 %v883_v11  ;;  %v944_v11 = vld [vmem:[%s1966_s3 + $0x8] sm:$0xf0]  ;;  %v1190_v17 = vld [vmem:[%s1968_s5 + $0xf0] sm:$0xf]  ;;  %v1340_v18 = vld [vmem:[%s1968_s5 + $0xf4] sm:$0xf0] }
  0x22   :  { %380 = vmatpush.bf16.msra.mxu2 %v951_v60  ;;  %v1192_v21 = vld [vmem:[%s1968_s5 + $0xf8] sm:$0xf0]  ;;  %v1182_v22 = vld [vmem:[%s1968_s5 + $0xe0] sm:$0xf]  ;;  %v1338_v23 = vld [vmem:[%s1968_s5 + $0xe4] sm:$0xf0] }
  0x23   :  { %150 = vmatmul.bf16.vlgmr.msra.gmra.mxu0 %v1260_v16  ;;  %394 = vmatpush.bf16.msra.mxu3 %v1015_v0  ;;  %v1126_v27 = vld [vmem:[%s1968_s5 + $0x70] sm:$0xf]  ;;  %v1183_v28 = vor.u32 %v1338_v23, %v1182_v22  ;;  %v1324_v29 = vld [vmem:[%s1968_s5 + $0x74] sm:$0xf0]  ;;  %v1323_v30 = vld [vmem:[%s1968_s5 + $0x74] sm:$0xf] }
  0x24   :  { %402 = vmatpush.bf16.msrb.mxu0 %v1003_v12  ;;  %164 = vmatmul.bf16.vlgmr.msra.gmra.mxu1 %v1260_v16  ;;  %v1007_v12 = vor.u32 %v1294_v9, %v1006_v7  ;;  %v1011_v16 = vor.u32 %v1293_v14, %v1008_v15  ;;  %v1127_v33 = vor.u32 %v1324_v29, %v1126_v27  ;;  %v1174_v35 = vld [vmem:[%s1968_s5 + $0xd0] sm:$0xf]  ;;  %v1336_v36 = vld [vmem:[%s1968_s5 + $0xd4] sm:$0xf0]  ;;  %v1335_v37 = vld [vmem:[%s1968_s5 + $0xd4] sm:$0xf] }
  0x25   :  { %416 = vmatpush.bf16.msrb.mxu1 %v1067_v13  ;;  %v947_v13 = vor.u32 %v1277_v10, %v944_v11  ;;  %v1176_v38 = vld [vmem:[%s1968_s5 + $0xd8] sm:$0xf0]  ;;  %v1118_v39 = vld [vmem:[%s1968_s5 + $0x60] sm:$0xf]  ;;  %v1322_v40 = vld [vmem:[%s1968_s5 + $0x64] sm:$0xf0] }
  0x26   :  { %381 = vmatpush.bf16.msra.mxu2 %v943_v8  ;;  %v1321_v42 = vld [vmem:[%s1968_s5 + $0x64] sm:$0xf]  ;;  %v1120_v43 = vld [vmem:[%s1968_s5 + $0x68] sm:$0xf0]  ;;  %v1179_v46 = vor.u32 %v1335_v37, %v1176_v38  ;;  %v1166_v47 = vld [vmem:[%s1968_s5 + $0xc0] sm:$0xf] }
  0x27   :  { %395 = vmatpush.bf16.msra.mxu3 %v1007_v12  ;;  %v1123_v45 = vor.u32 %v1321_v42, %v1120_v43  ;;  %v1334_v48 = vld [vmem:[%s1968_s5 + $0xc4] sm:$0xf0]  ;;  %v1333_v49 = vld [vmem:[%s1968_s5 + $0xc4] sm:$0xf]  ;;  %v1168_v50 = vld [vmem:[%s1968_s5 + $0xc8] sm:$0xf0] }
  0x28   :  { %403 = vmatpush.bf16.msrb.mxu0 %v995_v19  ;;  %v1339_v19 = vld [vmem:[%s1968_s5 + $0xf4] sm:$0xf]  ;;  %v1167_v51 = vor.u32 %v1334_v48, %v1166_v47  ;;  %v1171_v52 = vor.u32 %v1333_v49, %v1168_v50  ;;  %v50_v53 = vld [vmem:[%s1969_s2] sm:$0x3]  ;;  %v1110_v6 = vld [vmem:[%s1968_s5 + $0x50] sm:$0xf] }
  0x29   :  { %417 = vmatpush.bf16.msrb.mxu1 %v1059_v20  ;;  %v1191_v20 = vor.u32 %v1340_v18, %v1190_v17  ;;  %v1195_v24 = vor.u32 %v1339_v19, %v1192_v21  ;;  %v53_v57 = vperm.slane %v50_v53, 1  ;;  %v1320_v7 = vld [vmem:[%s1968_s5 + $0x54] sm:$0xf0]  ;;  %v1319_v8 = vld [vmem:[%s1968_s5 + $0x54] sm:$0xf] }
  0x2a   :  { %634 = vmatpush.bf16.msrb.mxu2 %v1127_v33  ;;  %v1111_v9 = vor.u32 %v1320_v7, %v1110_v6  ;;  %v1112_v10 = vld [vmem:[%s1968_s5 + $0x58] sm:$0xf0]  ;;  %v1158_v12 = vld [vmem:[%s1968_s5 + $0xb0] sm:$0xf]  ;;  %v1331_v14 = vld [vmem:[%s1968_s5 + $0xb4] sm:$0xf] }
  0x2b   :  { %648 = vmatpush.bf16.msrb.mxu3 %v1191_v20  ;;  %v1115_v11 = vor.u32 %v1319_v8, %v1112_v10  ;;  %v1102_v18 = vld [vmem:[%s1968_s5 + $0x40] sm:$0xf]  ;;  %v1318_v19 = vld [vmem:[%s1968_s5 + $0x44] sm:$0xf0]  ;;  %v1317_v20 = vld [vmem:[%s1968_s5 + $0x44] sm:$0xf] }
  0x2c   :  { %404 = vmatpush.bf16.msrb.mxu0 %v987_v25  ;;  %v1337_v25 = vld [vmem:[%s1968_s5 + $0xe4] sm:$0xf]  ;;  %v1103_v21 = vor.u32 %v1318_v19, %v1102_v18  ;;  %v1104_v22 = vld [vmem:[%s1968_s5 + $0x48] sm:$0xf0]  ;;  %v1328_v37 = vld [vmem:[%s1968_s5 + $0x94] sm:$0xf0] }
  0x2d   :  { %418 = vmatpush.bf16.msrb.mxu1 %v1051_v26  ;;  %v1184_v26 = vld [vmem:[%s1968_s5 + $0xe8] sm:$0xf0]  ;;  %v1107_v23 = vor.u32 %v1317_v20, %v1104_v22  ;;  %v1327_v38 = vld [vmem:[%s1968_s5 + $0x94] sm:$0xf]  ;;  %v1086_v42 = vld [vmem:[%s1968_s5 + $0x20] sm:$0xf] }
  0x2e   :  { %v1314_v43 = vld [vmem:[%s1968_s5 + $0x24] sm:$0xf0]  ;;  %v1134_v48 = vld [vmem:[%s1968_s5 + $0x80] sm:$0xf]  ;;  %v1325_v50 = vld [vmem:[%s1968_s5 + $0x84] sm:$0xf] }
  0x2f   :  { %649 = vmatpush.bf16.msrb.mxu3 %v1183_v28  ;;  %v1152_v28 = vld [vmem:[%s1968_s5 + $0xa8] sm:$0xf0]  ;;  %v1326_v49 = vld [vmem:[%s1968_s5 + $0x84] sm:$0xf0] }
  0x30   :  { %405 = vmatpush.bf16.msrb.mxu0 %v979_v31  ;;  %v1128_v31 = vld [vmem:[%s1968_s5 + $0x78] sm:$0xf0] }
  0x31   :  { %419 = vmatpush.bf16.msrb.mxu1 %v1043_v32  ;;  %v1187_v32 = vor.u32 %v1337_v25, %v1184_v26  ;;  %v1131_v34 = vor.u32 %v1323_v30, %v1128_v31  ;;  %v1330_v25 = vld [vmem:[%s1968_s5 + $0xa4] sm:$0xf0]  ;;  %v1329_v26 = vld [vmem:[%s1968_s5 + $0xa4] sm:$0xf]  ;;  %v1094_v30 = vld [vmem:[%s1968_s5 + $0x30] sm:$0xf] }
  0x32   :  { %v1155_v29 = vor.u32 %v1329_v26, %v1152_v28  ;;  %v1316_v31 = vld [vmem:[%s1968_s5 + $0x34] sm:$0xf0] }
  0x33   :  { %v1095_v33 = vor.u32 %v1316_v31, %v1094_v30  ;;  %v1354_v30 = vld [vmem:[%s1970_s7 + $0x68] sm:$0xff]  ;;  %v1347_v31 = vld [vmem:[%s1970_s7 + $0x30] sm:$0xff] }
  0x34   :  { %406 = vmatpush.bf16.msrb.mxu0 %v971_v41  ;;  %v1119_v41 = vor.u32 %v1322_v40, %v1118_v39  ;;  %v1144_v40 = vld [vmem:[%s1968_s5 + $0x98] sm:$0xf0] }
  0x35   :  { %420 = vmatpush.bf16.msrb.mxu1 %v1035_v44  ;;  %v1175_v44 = vor.u32 %v1336_v36, %v1174_v35  ;;  %v1142_v36 = vld [vmem:[%s1968_s5 + $0x90] sm:$0xf] }
  0x36   :  { %635 = vmatpush.bf16.msrb.mxu2 %v1119_v41  ;;  %v1143_v39 = vor.u32 %v1328_v37, %v1142_v36  ;;  %v1147_v41 = vor.u32 %v1327_v38, %v1144_v40  ;;  %v1351_v36 = vld [vmem:[%s1970_s7 + $0x50] sm:$0xff]  ;;  %v1344_v37 = vld [vmem:[%s1970_s7 + $0x18] sm:$0xff]  ;;  %v1350_v38 = vld [vmem:[%s1970_s7 + $0x48] sm:$0xff] }
  0x37   :  { %650 = vmatpush.bf16.msrb.mxu3 %v1175_v44  ;;  %v1313_v44 = vld [vmem:[%s1968_s5 + $0x24] sm:$0xf] }
  0x38   :  { %407 = vmatpush.bf16.msrb.mxu0 %v963_v55  ;;  %v1349_v40 = vld [vmem:[%s1970_s7 + $0x40] sm:$0xff] }
  0x39   :  { %421 = vmatpush.bf16.msrb.mxu1 %v1027_v56  ;;  %v52_v56 = vperm.slane %v50_v53, 0 }
  0x3a   :  { %636 = vmatpush.bf16.msrb.mxu2 %v1111_v9 }
  0x3b   :  { %651 = vmatpush.bf16.msrb.mxu3 %v1167_v51  ;;  %v1135_v51 = vor.u32 %v1326_v49, %v1134_v48 }
  0x3c   :  { %408 = vmatpush.bf16.msrb.mxu0 %v955_v1 }
  0x3d   :  { %422 = vmatpush.bf16.msrb.mxu1 %v1019_v4 }
  0x3e   :  { %637 = vmatpush.bf16.msrb.mxu2 %v1103_v21 }
  0x40   :  { %409 = vmatpush.bf16.msrb.mxu0 %v947_v13  ;;  %v1332_v13 = vld [vmem:[%s1968_s5 + $0xb4] sm:$0xf0] }
  0x41   :  { %423 = vmatpush.bf16.msrb.mxu1 %v1011_v16  ;;  %v1159_v15 = vor.u32 %v1332_v13, %v1158_v12  ;;  %v1160_v16 = vld [vmem:[%s1968_s5 + $0xb8] sm:$0xf0] }
  0x42   :  { %v1163_v17 = vor.u32 %v1331_v14, %v1160_v16  ;;  %638 = vmatpush.bf16.msrb.mxu2 %v1095_v33  ;;  %v1346_v33 = vld [vmem:[%s1970_s7 + $0x28] sm:$0xff] }
  0x43   :  { %652 = vmatpush.bf16.msrb.mxu3 %v1159_v15 }
  0x44   :  { %662 = vmatpush.bf16.msra.mxu0 %v1131_v34  ;;  %v1096_v34 = vld [vmem:[%s1968_s5 + $0x38] sm:$0xf0] }
  0x45   :  { %676 = vmatpush.bf16.msra.mxu1 %v1195_v24  ;;  %v1150_v24 = vld [vmem:[%s1968_s5 + $0xa0] sm:$0xf] }
  0x46   :  { %v1151_v27 = vor.u32 %v1330_v25, %v1150_v24 }
  0x48   :  { %663 = vmatpush.bf16.msra.mxu0 %v1123_v45  ;;  %653 = vmatpush.bf16.msrb.mxu3 %v1151_v27  ;;  %v1087_v45 = vor.u32 %v1314_v43, %v1086_v42  ;;  %v1341_v42 = vld [vmem:[%s1970_s7] sm:$0xff] }
  0x49   :  { %677 = vmatpush.bf16.msra.mxu1 %v1187_v32  ;;  %v1315_v32 = vld [vmem:[%s1968_s5 + $0x34] sm:$0xf]  ;;  %v468_v43 = vld [vmem:[%s1972_s6] sm:$0x3] }
  0x4a   :  { %v1099_v35 = vor.u32 %v1315_v32, %v1096_v34  ;;  %639 = vmatpush.bf16.msrb.mxu2 %v1087_v45  ;;  %v1353_v32 = vld [vmem:[%s1970_s7 + $0x60] sm:$0xff]  ;;  %v1352_v34 = vld [vmem:[%s1970_s7 + $0x58] sm:$0xff] }
  0x4c   :  { %664 = vmatpush.bf16.msra.mxu0 %v1115_v11  ;;  %654 = vmatpush.bf16.msrb.mxu3 %v1143_v39  ;;  %v1343_v39 = vld [vmem:[%s1970_s7 + $0x10] sm:$0xff] }
  0x4d   :  { %678 = vmatpush.bf16.msra.mxu1 %v1179_v46  ;;  %v1088_v46 = vld [vmem:[%s1968_s5 + $0x28] sm:$0xf0] }
  0x4e   :  { %v1091_v47 = vor.u32 %v1313_v44, %v1088_v46  ;;  %v471_v46 = vperm.slane %v468_v43, 1 }
  0x50   :  { %665 = vmatpush.bf16.msra.mxu0 %v1107_v23  ;;  %655 = vmatpush.bf16.msrb.mxu3 %v1135_v51 }
  0x51   :  { %679 = vmatpush.bf16.msra.mxu1 %v1171_v52  ;;  %v1136_v52 = vld [vmem:[%s1968_s5 + $0x88] sm:$0xf0] }
  0x52   :  { %v1139_v53 = vor.u32 %v1325_v50, %v1136_v52  ;;  %v470_v50 = vperm.slane %v468_v43, 0 }
  0x54   :  { %666 = vmatpush.bf16.msra.mxu0 %v1099_v35  ;;  %v1345_v35 = vld [vmem:[%s1970_s7 + $0x20] sm:$0xff] }
  0x55   :  { %680 = vmatpush.bf16.msra.mxu1 %v1163_v17 }
  0x58   :  { %667 = vmatpush.bf16.msra.mxu0 %v1091_v47 }
  0x59   :  { %681 = vmatpush.bf16.msra.mxu1 %v1155_v29 }
  0x5d   :  { %682 = vmatpush.bf16.msra.mxu1 %v1147_v41  ;;  %v1342_v41 = vld [vmem:[%s1970_s7 + $0x8] sm:$0xff] }
  0x61   :  { %683 = vmatpush.bf16.msra.mxu1 %v1139_v53 }
  0xa0   :  { %v151_v54 = vpop.f32.mrf.mxu0 }
  0xa1   :  { %v165_v55 = vpop.f32.mrf.mxu1  ;;  %v152_v58 = vadd.f32 %v151_v54, %v52_v56  ;;  %v1078_v54 = vld [vmem:[%s1968_s5 + $0x10] sm:$0xf] }
  0xa2   :  { %v166_v59 = vadd.f32 %v165_v55, %v53_v57  ;;  %v1312_v55 = vld [vmem:[%s1968_s5 + $0x14] sm:$0xf0] }
  0xa3   :  { %v170_v0 = vmax.f32 %v152_v58, 0.0  ;;  %v1080_v58 = vld [vmem:[%s1968_s5 + $0x18] sm:$0xf0] }
  0xa4   :  { %v171_v2 = vmax.f32 %v166_v59, 0.0 }
  0xa8   :  { %v153_v60 = vpop.f32.mrf.mxu0 }
  0xa9   :  { %v154_v61 = vadd.f32 %v153_v60, %v52_v56  ;;  %v167_v62 = vpop.f32.mrf.mxu1  ;;  %v1311_v56 = vld [vmem:[%s1968_s5 + $0x14] sm:$0xf]  ;;  %v1070_v60 = vld [vmem:[%s1968_s5] sm:$0xf] }
  0xaa   :  { %v168_v63 = vadd.f32 %v167_v62, %v53_v57  ;;  %v1079_v57 = vor.u32 %v1312_v55, %v1078_v54  ;;  %v1083_v59 = vor.u32 %v1311_v56, %v1080_v58  ;;  %v1309_v62 = vld [vmem:[%s1968_s5 + $0x4] sm:$0xf] }
  0xab   :  { %v172_v1 = vmax.f32 %v154_v61, 0.0  ;;  %v1310_v61 = vld [vmem:[%s1968_s5 + $0x4] sm:$0xf0] }
  0xac   :  { %v173_v3 = vmax.f32 %v168_v63, 0.0  ;;  %640 = vmatpush.bf16.msrb.mxu2 %v1079_v57  ;;  %668 = vmatpush.bf16.msra.mxu0 %v1083_v59  ;;  %v1071_v63 = vor.u32 %v1310_v61, %v1070_v60 }
  0xad   :  { %v174_v4 = vpack.c.bf16 %v172_v1, %v170_v0  ;;  %v1072_v0 = vld [vmem:[%s1968_s5 + $0x8] sm:$0xf0] }
  0xae   :  { %v175_v5 = vpack.c.bf16 %v173_v3, %v171_v2  ;;  %v1075_v1 = vor.u32 %v1309_v62, %v1072_v0  ;;  %v1356_v2 = vld [vmem:[%s1970_s7 + $0x78] sm:$0xff] }
  0xaf   :  { %382 = vmatmul.bf16.vlgmr.msra.gmra.mxu2 %v174_v4  ;;  %410 = vmatmul.bf16.vlgmr.msrb.gmra.mxu0 %v174_v4  ;;  %v1348_v3 = vld [vmem:[%s1970_s7 + $0x38] sm:$0xff]  ;;  %v1355_v4 = vld [vmem:[%s1970_s7 + $0x70] sm:$0xff] }
  0xb0   :  { %396 = vmatmul.bf16.vlgmr.msra.gmra.mxu3 %v175_v5  ;;  %424 = vmatmul.bf16.vlgmr.msrb.gmra.mxu1 %v175_v5  ;;  %v208_v5 = vld [vmem:[%s1971_s4] sm:$0x3] }
  0xb1   :  { %641 = vmatpush.bf16.msrb.mxu2 %v1071_v63  ;;  %669 = vmatpush.bf16.msra.mxu0 %v1075_v1  ;;  %v211_v7 = vperm.slane %v208_v5, 1  ;;  %v210_v11 = vperm.slane %v208_v5, 0 }
  0xb2   :  { %842 = vmatpush.bf16.msra.mxu3 %v1356_v2 }
  0xb5   :  { %828 = vmatpush.bf16.msra.mxu2 %v1348_v3 }
  0xb6   :  { %843 = vmatpush.bf16.msra.mxu3 %v1355_v4  ;;  %v1357_v4 = vld [vmem:[%s1973_s8] ss:$0 sm:$0xff] }
  0xb9   :  { %829 = vmatpush.bf16.msra.mxu2 %v1347_v31 }
  0xba   :  { %844 = vmatpush.bf16.msra.mxu3 %v1354_v30 }
  0xbd   :  { %830 = vmatpush.bf16.msra.mxu2 %v1346_v33 }
  0xbe   :  { %845 = vmatpush.bf16.msra.mxu3 %v1353_v32 }
  0xc1   :  { %831 = vmatpush.bf16.msra.mxu2 %v1345_v35 }
  0xc2   :  { %846 = vmatpush.bf16.msra.mxu3 %v1352_v34 }
  0xc5   :  { %832 = vmatpush.bf16.msra.mxu2 %v1344_v37 }
  0xc6   :  { %847 = vmatpush.bf16.msra.mxu3 %v1351_v36 }
  0xc9   :  { %833 = vmatpush.bf16.msra.mxu2 %v1343_v39 }
  0xca   :  { %848 = vmatpush.bf16.msra.mxu3 %v1350_v38 }
  0xcd   :  { %834 = vmatpush.bf16.msra.mxu2 %v1342_v41 }
  0xce   :  { %849 = vmatpush.bf16.msra.mxu3 %v1349_v40 }
  0xd1   :  { %835 = vmatpush.bf16.msra.mxu2 %v1341_v42 }
 0x12c   :  { %v411_v6 = vpop.f32.mrf.mxu0 }
 0x12d   :  { %v425_v8 = vpop.f32.mrf.mxu1  ;;  %v412_v9 = vadd.f32 %v411_v6, %v211_v7 }
 0x12f   :  { %v426_v14 = vadd.f32 %v425_v8, %v412_v9 }
 0x131   :  { %v431_v19 = vmax.f32 %v426_v14, 0.0 }
 0x132   :  { %v383_v10 = vpop.f32.mrf.mxu2 }
 0x133   :  { %v397_v12 = vpop.f32.mrf.mxu3  ;;  %v384_v17 = vadd.f32 %v383_v10, %v210_v11 }
 0x134   :  { %v413_v13 = vpop.f32.mrf.mxu0 }
 0x135   :  { %v414_v15 = vadd.f32 %v413_v13, %v211_v7  ;;  %v427_v16 = vpop.f32.mrf.mxu1  ;;  %v398_v22 = vadd.f32 %v397_v12, %v384_v17 }
 0x137   :  { %v428_v18 = vadd.f32 %v427_v16, %v414_v15  ;;  %v430_v27 = vmax.f32 %v398_v22, 0.0 }
 0x139   :  { %v433_v20 = vmax.f32 %v428_v18, 0.0 }
 0x13a   :  { %v385_v21 = vpop.f32.mrf.mxu2 }
 0x13b   :  { %v435_v23 = vpack.c.bf16 %v433_v20, %v431_v19  ;;  %v386_v24 = vadd.f32 %v385_v21, %v210_v11  ;;  %v399_v25 = vpop.f32.mrf.mxu3 }
 0x13d   :  { %v400_v26 = vadd.f32 %v399_v25, %v386_v24  ;;  %656 = vmatmul.bf16.vlgmr.msrb.gmra.mxu3 %v435_v23  ;;  %684 = vmatmul.bf16.vlgmr.msra.gmra.mxu1 %v435_v23 }
 0x13f   :  { %v432_v28 = vmax.f32 %v400_v26, 0.0 }
 0x141   :  { %v434_v29 = vpack.c.bf16 %v432_v28, %v430_v27 }
 0x143   :  { %642 = vmatmul.bf16.vlgmr.msrb.gmra.mxu2 %v434_v29  ;;  %670 = vmatmul.bf16.vlgmr.msra.gmra.mxu0 %v434_v29 }
 0x1ba   :  { %v685_v44 = vpop.f32.mrf.mxu1 }
 0x1c0   :  { %v671_v45 = vpop.f32.mrf.mxu0  ;;  %v657_v48 = vpop.f32.mrf.mxu3 }
 0x1c1   :  { %v672_v47 = vadd.f32 %v671_v45, %v471_v46 }
 0x1c2   :  { %v687_v54 = vpop.f32.mrf.mxu1 }
 0x1c3   :  { %v686_v52 = vadd.f32 %v685_v44, %v672_v47 }
 0x1c5   :  { %v691_v57 = vmax.f32 %v686_v52, 0.0 }
 0x1c6   :  { %v643_v49 = vpop.f32.mrf.mxu2 }
 0x1c7   :  { %v644_v55 = vadd.f32 %v643_v49, %v470_v50 }
 0x1c8   :  { %v673_v51 = vpop.f32.mrf.mxu0  ;;  %v659_v63 = vpop.f32.mrf.mxu3 }
 0x1c9   :  { %v674_v53 = vadd.f32 %v673_v51, %v471_v46  ;;  %v658_v60 = vadd.f32 %v657_v48, %v644_v55 }
 0x1cb   :  { %v688_v56 = vadd.f32 %v687_v54, %v674_v53  ;;  %v690_v1 = vmax.f32 %v658_v60, 0.0 }
 0x1cd   :  { %v693_v58 = vmax.f32 %v688_v56, 0.0 }
 0x1ce   :  { %v645_v59 = vpop.f32.mrf.mxu2 }
 0x1cf   :  { %v695_v61 = vpack.c.bf16 %v693_v58, %v691_v57  ;;  %v646_v62 = vadd.f32 %v645_v59, %v470_v50 }
 0x1d1   :  { %v660_v0 = vadd.f32 %v659_v63, %v646_v62  ;;  %850 = vmatmul.bf16.vlgmr.msra.gmra.mxu3 %v695_v61 }
 0x1d3   :  { %v692_v2 = vmax.f32 %v660_v0, 0.0 }
 0x1d5   :  { %v694_v3 = vpack.c.bf16 %v692_v2, %v690_v1 }
 0x1d7   :  { %836 = vmatmul.bf16.vlgmr.msra.gmra.mxu2 %v694_v3 }
 0x254   :  { %v851_v5 = vpop.f32.mrf.mxu3 }
 0x25a   :  { %v837_v6 = vpop.f32.mrf.mxu2 }
 0x25b   :  { %v838_v7 = vadd.f32 %v1357_v4, %v837_v6 }
 0x25c   :  { %v853_v13 = vpop.f32.mrf.mxu3 }
 0x25d   :  { %v852_v8 = vadd.f32 %v851_v5, %v838_v7 }
 0x25f   :  { %v856_v9 = vsub.f32 0.0, %v852_v8 }
 0x261   :  { %v858_v10 = vmul.f32 1.442695, %v856_v9 }
 0x262   :  { %v839_v11 = vpop.f32.mrf.mxu2 }
 0x263   :  { %1358 = vpow2.f32 %v858_v10  ;;  %v840_v12 = vadd.f32 %v1357_v4, %v839_v11 }
 0x265   :  { %v854_v14 = vadd.f32 %v853_v13, %v840_v12 }
 0x267   :  { %v857_v15 = vsub.f32 0.0, %v854_v14 }
 0x269   :  { %v1359_v16 = vpop.eup %1358  ;;  %v860_v17 = vmul.f32 1.442695, %v857_v15 }
 0x26a   :  { %v862_v18 = vadd.f32 1.0, %v1359_v16 }
 0x26b   :  { %1360 = vpow2.f32 %v860_v17 }
 0x26c   :  { %1362 = vrcp.f32 %v862_v18 }
 0x271   :  { %v1361_v19 = vpop.eup %1360 }
 0x272   :  { %v1363_v20 = vpop.eup %1362  ;;  %v863_v21 = vadd.f32 1.0, %v1361_v19 }
 0x273   :  { %866 = vst [vmem:[%s1974_s9] sm:$0xff] %v1363_v20 }
 0x274   :  { %1364 = vrcp.f32 %v863_v21 }
 0x27a   :  { %v1365_v22 = vpop.eup %1364 }
 0x27b   :  { %867 = vst [vmem:[%s1974_s9 + $0x8] sm:$0xff] %v1365_v22 }

</bundles_post_ra>
